<compile_context>
chip_gen: v6e
topology: v6e:2x2x1
jax: 0.10.0
libtpu: 0.0.40
codegen_flags: <defaults>
</compile_context>

<pallas_src>
import functools

import jax
import jax.numpy as jnp
from jax.experimental import pallas as pl
from jax.experimental.pallas import tpu as pltpu


def _round_up(a: int, b: int) -> int:
    return (a + b - 1) // b * b


def _conv_relu_fold_kernel(x_ref, w_ref, b_ref, o_ref, *, tap_offsets, l_tile):
    # Folded-tap path (small Cin): one deep MXU matmul per block.
    # x_ref: (1, 1, Cin_p, L_WIN) bf16 ; w_ref: (Cout_p, KH*KW*Cin_p) bf16
    # b_ref: (Cout_p, 1) f32 ; o_ref: (1, 1, Cout_p, L_TILE)
    x = x_ref[0, 0]                                          # (Cin_p, L_WIN)
    # Stack the KH*KW lane-shifted tap views along the contraction (sublane)
    # axis -> (KH*KW*Cin_p, L_TILE); single matmul instead of KH*KW shallow ones.
    xs = jnp.concatenate([x[:, off:off + l_tile] for off in tap_offsets], axis=0)
    acc = jnp.dot(w_ref[...], xs, preferred_element_type=jnp.float32)
    acc = acc + b_ref[...]                                   # bias broadcast
    o_ref[0, 0] = jnp.maximum(acc, 0.0).astype(o_ref.dtype)  # fused ReLU, lane-dense store


def _conv_relu_taps_kernel(x_ref, w_ref, b_ref, o_ref, *, tap_offsets, l_tile):
    # Per-tap path (large Cin): KH*KW accumulating matmuls, acc kept in vregs.
    # w_ref: (KH*KW, Cout_p, Cin_p) bf16
    x = x_ref[0, 0]
    acc = None
    for t, off in enumerate(tap_offsets):                    # static unroll
        xt = x[:, off:off + l_tile]
        part = jnp.dot(w_ref[t], xt, preferred_element_type=jnp.float32)
        acc = part if acc is None else acc + part
    acc = acc + b_ref[...]
    o_ref[0, 0] = jnp.maximum(acc, 0.0).astype(o_ref.dtype)


def convolution_2d(x, weight, bias, *, kernel_size, padding, stride=1,
                   out_dtype=jnp.float32, max_l_tile=2048, fold_k_max=256):
    """nn.Conv2d + nn.ReLU forward (PyTorch semantics).

    x:      (N, Cin, H, W)       float32 NCHW
    weight: (Cout, Cin, KH, KW)  PyTorch Conv2d weight layout
    bias:   (Cout,)
    """
    N, Cin, H, W = x.shape
    Cout, Cin_w, KH, KW = weight.shape
    assert Cin == Cin_w and KH == kernel_size and KW == kernel_size
    s, p = stride, padding
    assert s >= 1 and p >= 0
    Ho = (H + 2 * p - KH) // s + 1
    Wo = (W + 2 * p - KW) // s + 1
    Hp, Wp = H + 2 * p, W + 2 * p
    Hf, Wf = Hp - KH + 1, Wp - KW + 1           # stride-1 full-grid output extent

    # Channel padding: Cin to a multiple of 8 (contraction), Cout to 16 so the
    # weight / output tiles are unmasked on the sublane axis.
    Cin_p = max(8, _round_up(Cin, 8))
    Cout_p = max(16, _round_up(Cout, 16))
    K = KH * KW * Cin_p
    fold = K <= fold_k_max
    out_bytes = jnp.dtype(out_dtype).itemsize

    # ---- L-tiling with halo ----
    L_img = Hp * Wp
    max_off = (KH - 1) * Wp + (KW - 1)
    halo = _round_up(max_off, 128)

    def _step_bytes(lt):                         # per-grid-step VMEM footprint
        xwin = Cin_p * (lt + halo) * 2
        oblk = Cout_p * lt * out_bytes
        tmp = (K * lt * 2 if fold else 0) + Cout_p * lt * 4   # stacked taps + f32 acc
        return 2 * (xwin + oblk) + tmp           # x/out double-buffered

    l_tile = min(_round_up(L_img, 128), max_l_tile)
    while l_tile > 128 and _step_bytes(l_tile) > (12 << 20):
        l_tile = max(128, _round_up(l_tile // 2, 128))
    L_WIN = l_tile + halo                        # halo'd input window per tile
    num_l = pl.cdiv(L_img, l_tile)
    L_out_total = num_l * l_tile
    L_flat = L_out_total + halo                  # flat input length needed

    # ---- wrapper glue: cast once, ONE pad (channels + spatial halo + tail rows) ----
    er = -(-(L_flat - L_img) // Wp)              # extra zero rows for the flat tail
    x_bf = x.astype(jnp.bfloat16)
    x_pad = jnp.pad(x_bf, ((0, 0), (0, Cin_p - Cin), (p, p + er), (p, p)))
    x_flat = x_pad.reshape(N, Cin_p, (Hp + er) * Wp)
    if num_l == 1:
        x_tiles = x_flat[:, None, :, :L_WIN]
    else:
        # Overlapping halo windows per L-tile (duplication = halo/l_tile, small).
        x_tiles = jnp.stack(
            [x_flat[:, :, li * l_tile: li * l_tile + L_WIN] for li in range(num_l)],
            axis=1)                              # (N, num_l, Cin_p, L_WIN)

    w_p = jnp.pad(weight, ((0, Cout_p - Cout), (0, Cin_p - Cin),
                           (0, 0), (0, 0))).astype(jnp.bfloat16)
    if fold:
        # W2[o, (kh*KW+kw)*Cin_p + c] = w[o, c, kh, kw]  (matches tap stacking order)
        w_op = w_p.transpose(0, 2, 3, 1).reshape(Cout_p, K)
        w_spec = pl.BlockSpec((Cout_p, K), lambda n, l: (0, 0))
        w_res_bytes = Cout_p * _round_up(K, 128) * 2
    else:
        w_op = w_p.transpose(2, 3, 0, 1).reshape(KH * KW, Cout_p, Cin_p)
        w_spec = pl.BlockSpec((KH * KW, Cout_p, Cin_p), lambda n, l: (0, 0, 0))
        w_res_bytes = KH * KW * Cout_p * _round_up(Cin_p, 128) * 2
    b_col = jnp.pad(bias, (0, Cout_p - Cout)).reshape(Cout_p, 1).astype(jnp.float32)
    b_res_bytes = Cout_p * 128 * 4

    tap_offsets = tuple(kh * Wp + kw for kh in range(KH) for kw in range(KW))
    kern_fn = _conv_relu_fold_kernel if fold else _conv_relu_taps_kernel
    kernel = functools.partial(kern_fn, tap_offsets=tap_offsets, l_tile=l_tile)

    # VMEM limit consistent with the tile choice (never clamped below the need);
    # 48 MiB cap leaves headroom on v7x's 64 MiB. (Optionally pl.Buffered(3) on
    # the x spec on v6e with its larger VMEM.)
    vmem_need = _step_bytes(l_tile) + 2 * (w_res_bytes + b_res_bytes) + (2 << 20)
    vmem_limit = int(min(max(vmem_need, 8 << 20), 48 << 20))

    cost = pl.CostEstimate(
        flops=2 * N * num_l * Cout_p * K * l_tile,
        transcendentals=0,
        bytes_accessed=(x_tiles.size * 2 + w_op.size * 2 + b_col.size * 4
                        + N * num_l * Cout_p * l_tile * out_bytes),
    )

    out_tiles = pl.pallas_call(
        kernel,
        out_shape=jax.ShapeDtypeStruct((N, num_l, Cout_p, l_tile), out_dtype),
        grid_spec=pltpu.PrefetchScalarGridSpec(
            num_scalar_prefetch=0,
            grid=(N, num_l),                      # both parallel -> feeds 2 TCs on v7x
            in_specs=[
                pl.BlockSpec((1, 1, Cin_p, L_WIN), lambda n, l: (n, l, 0, 0)),
                w_spec,                           # constant index map -> VMEM resident
                pl.BlockSpec((Cout_p, 1), lambda n, l: (0, 0)),
            ],
            out_specs=pl.BlockSpec((1, 1, Cout_p, l_tile), lambda n, l: (n, l, 0, 0)),
        ),
        compiler_params=pltpu.CompilerParams(
            dimension_semantics=("parallel", "parallel"),
            vmem_limit_bytes=vmem_limit,
        ),
        cost_estimate=cost,
    )(x_tiles, w_op, b_col)

    # ---- wrapper glue: un-tile, drop channel/lane padding, apply stride ----
    out = out_tiles.transpose(0, 2, 1, 3).reshape(N, Cout_p, L_out_total)
    out = out[:, :Cout, :Hf * Wp].reshape(N, Cout, Hf, Wp)[:, :, :, :Wf]
    if s != 1:
        # TODO(synk): compute strided outputs directly in-kernel (this path does
        # s^2 extra MXU work and stores before subsampling).
        out = out[:, :, ::s, ::s]
    assert out.shape == (N, Cout, Ho, Wo)
    return out.astype(jnp.float32)


def reference_conv_relu(x, weight, bias, *, kernel_size, padding, stride=1):
    """Independent tap-sum reference of Conv2d + ReLU."""
    N, Cin, H, W = x.shape
    Cout = weight.shape[0]
    KH = KW = kernel_size
    s, p = stride, padding
    Ho = (H + 2 * p - KH) // s + 1
    Wo = (W + 2 * p - KW) // s + 1
    xp = jnp.pad(x, ((0, 0), (0, 0), (p, p), (p, p)))
    out = jnp.zeros((N, Cout, Ho, Wo), jnp.float32)
    for kh in range(KH):
        for kw in range(KW):
            xs = xp[:, :, kh:kh + (Ho - 1) * s + 1:s, kw:kw + (Wo - 1) * s + 1:s]
            out = out + jnp.einsum('nchw,oc->nohw', xs, weight[:, :, kh, kw])
    out = out + bias.reshape(1, Cout, 1, 1)
    return jnp.maximum(out, 0.0)


if __name__ == "__main__":
    # Module config: Convolution2D(in_channels=4, out_channels=8,
    #                              kernel_size=3, padding=1, stride=1)
    N, Cin, Cout, H, W = 2, 4, 8, 16, 16
    kernel_size, padding, stride = 3, 1, 1

    key = jax.random.PRNGKey(0)
    kx, kw_, kb = jax.random.split(key, 3)
    x = jax.random.normal(kx, (N, Cin, H, W), dtype=jnp.float32)
    weight = 0.1 * jax.random.normal(kw_, (Cout, Cin, kernel_size, kernel_size),
                                     dtype=jnp.float32)
    bias = 0.1 * jax.random.normal(kb, (Cout,), dtype=jnp.float32)

    out = convolution_2d(x, weight, bias, kernel_size=kernel_size,
                         padding=padding, stride=stride)
    out = jax.block_until_ready(out)

    # Reference sees the same bf16 operand quantization (kernel accumulates f32).
    xq = x.astype(jnp.bfloat16).astype(jnp.float32)
    wq = weight.astype(jnp.bfloat16).astype(jnp.float32)
    ref = reference_conv_relu(xq, wq, bias, kernel_size=kernel_size,
                              padding=padding, stride=stride)
    assert out.shape == ref.shape == (N, Cout, H, W), (out.shape, ref.shape)
    assert jnp.allclose(out, ref, atol=2e-3, rtol=2e-3), \
        float(jnp.max(jnp.abs(out - ref)))

    # Also exercise the L-tiled halo path: 48x48 padded image -> L_img=2500 > 2048,
    # grid = (1, 2) with an overlapping halo window between the two lane tiles.
    H2 = W2 = 48
    x2 = jax.random.normal(jax.random.PRNGKey(1), (1, Cin, H2, W2), dtype=jnp.float32)
    out2 = jax.block_until_ready(
        convolution_2d(x2, weight, bias, kernel_size=kernel_size,
                       padding=padding, stride=stride))
    ref2 = reference_conv_relu(x2.astype(jnp.bfloat16).astype(jnp.float32), wq, bias,
                               kernel_size=kernel_size, padding=padding, stride=stride)
    assert out2.shape == ref2.shape == (1, Cout, H2, W2), (out2.shape, ref2.shape)
    assert jnp.allclose(out2, ref2, atol=2e-3, rtol=2e-3), \
        float(jnp.max(jnp.abs(out2 - ref2)))

    print("KERNEL_OK")
</pallas_src>

<mosaic_0001>
module attributes {stable_mosaic.version = 11 : i64} {
  func.func @_conv_relu_fold_kernel(%arg0: i32, %arg1: i32, %arg2: memref<1x1x8x512xbf16, #tpu.memory_space<vmem>>, %arg3: memref<16x72xbf16, #tpu.memory_space<vmem>>, %arg4: memref<16x1xf32, #tpu.memory_space<vmem>>, %arg5: memref<1x1x16x384xf32, #tpu.memory_space<vmem>>) attributes {dimension_semantics = [#tpu.dimension_semantics<parallel>, #tpu.dimension_semantics<parallel>], iteration_bounds = array<i64: 2, 1>, scalar_prefetch = 0 : i64, scratch_operands = 0 : i64, tpu.core_type = #tpu.core_type<tc>, window_params = [{transform_indices = @transform_0, window_bounds = array<i64: 1, 1, 8, 512>}, {pipeline_mode = #tpu.pipeline_mode<synchronous>, transform_indices = @transform_1, window_bounds = array<i64: 16, 72>}, {pipeline_mode = #tpu.pipeline_mode<synchronous>, transform_indices = @transform_2, window_bounds = array<i64: 16, 1>}, {transform_indices = @transform_3, window_bounds = array<i64: 1, 1, 16, 384>}]} {
    %c0 = arith.constant 0 : index
    %c0_0 = arith.constant 0 : index
    %c0_1 = arith.constant 0 : index
    %c0_2 = arith.constant 0 : index
    %0 = vector.load %arg2[%c0, %c0_0, %c0_1, %c0_2] : memref<1x1x8x512xbf16, #tpu.memory_space<vmem>>, vector<1x1x8x512xbf16>
    %1 = vector.shape_cast %0 : vector<1x1x8x512xbf16> to vector<8x512xbf16>
    %2 = vector.extract_strided_slice %1 {offsets = [0, 0], sizes = [8, 384], strides = [1, 1]} : vector<8x512xbf16> to vector<8x384xbf16>
    %3 = vector.extract_strided_slice %1 {offsets = [0, 1], sizes = [8, 384], strides = [1, 1]} : vector<8x512xbf16> to vector<8x384xbf16>
    %4 = vector.extract_strided_slice %1 {offsets = [0, 2], sizes = [8, 384], strides = [1, 1]} : vector<8x512xbf16> to vector<8x384xbf16>
    %5 = vector.extract_strided_slice %1 {offsets = [0, 18], sizes = [8, 384], strides = [1, 1]} : vector<8x512xbf16> to vector<8x384xbf16>
    %6 = vector.extract_strided_slice %1 {offsets = [0, 19], sizes = [8, 384], strides = [1, 1]} : vector<8x512xbf16> to vector<8x384xbf16>
    %7 = vector.extract_strided_slice %1 {offsets = [0, 20], sizes = [8, 384], strides = [1, 1]} : vector<8x512xbf16> to vector<8x384xbf16>
    %8 = vector.extract_strided_slice %1 {offsets = [0, 36], sizes = [8, 384], strides = [1, 1]} : vector<8x512xbf16> to vector<8x384xbf16>
    %9 = vector.extract_strided_slice %1 {offsets = [0, 37], sizes = [8, 384], strides = [1, 1]} : vector<8x512xbf16> to vector<8x384xbf16>
    %10 = vector.extract_strided_slice %1 {offsets = [0, 38], sizes = [8, 384], strides = [1, 1]} : vector<8x512xbf16> to vector<8x384xbf16>
    %11 = tpu.concatenate %2, %3, %4, %5, %6, %7, %8, %9, %10 in 0 : vector<8x384xbf16>, vector<8x384xbf16>, vector<8x384xbf16>, vector<8x384xbf16>, vector<8x384xbf16>, vector<8x384xbf16>, vector<8x384xbf16>, vector<8x384xbf16>, vector<8x384xbf16> -> vector<72x384xbf16>
    %c0_3 = arith.constant 0 : index
    %c0_4 = arith.constant 0 : index
    %12 = vector.load %arg3[%c0_3, %c0_4] : memref<16x72xbf16, #tpu.memory_space<vmem>>, vector<16x72xbf16>
    %cst = arith.constant dense<0.000000e+00> : vector<16x384xf32>
    %13 = tpu.matmul %12, %11, %cst {dimension_numbers = #tpu.dot_dimension_numbers<[1], [0], [0], [1], [0, 0, 1, 1], [], []>} : vector<16x72xbf16>, vector<72x384xbf16>, vector<16x384xf32> -> vector<16x384xf32>
    %c0_5 = arith.constant 0 : index
    %c0_6 = arith.constant 0 : index
    %14 = vector.load %arg4[%c0_5, %c0_6] : memref<16x1xf32, #tpu.memory_space<vmem>>, vector<16x1xf32>
    %15 = vector.broadcast %14 : vector<16x1xf32> to vector<16x384xf32>
    %16 = arith.addf %13, %15 : vector<16x384xf32>
    %cst_7 = arith.constant 0.000000e+00 : f32
    %17 = vector.broadcast %cst_7 : f32 to vector<16x384xf32>
    %18 = arith.maximumf %16, %17 : vector<16x384xf32>
    %c0_8 = arith.constant 0 : index
    %c0_9 = arith.constant 0 : index
    %c0_10 = arith.constant 0 : index
    %c0_11 = arith.constant 0 : index
    %19 = vector.load %arg5[%c0_8, %c0_9, %c0_10, %c0_11] : memref<1x1x16x384xf32, #tpu.memory_space<vmem>>, vector<1x1x16x384xf32>
    %20 = vector.shape_cast %19 : vector<1x1x16x384xf32> to vector<16x384xf32>
    %21 = vector.shape_cast %18 : vector<16x384xf32> to vector<1x1x16x384xf32>
    tpu.vector_store %arg5[%c0_8, %c0_9, %c0_10, %c0_11], %21 {strides = array<i32>} : memref<1x1x16x384xf32, #tpu.memory_space<vmem>>, vector<1x1x16x384xf32>,
    return
  }
  func.func @transform_0(%arg0: i32, %arg1: i32) -> (i32, i32, i32, i32) {
    %c0_i32 = arith.constant 0 : i32
    %c0_i32_0 = arith.constant 0 : i32
    %c0_i32_1 = arith.constant 0 : i32
    return %arg0, %arg1, %c0_i32, %c0_i32_0 : i32, i32, i32, i32
  }
  func.func @transform_1(%arg0: i32, %arg1: i32) -> (i32, i32) {
    %c0_i32 = arith.constant 0 : i32
    %c0_i32_0 = arith.constant 0 : i32
    %c0_i32_1 = arith.constant 0 : i32
    return %c0_i32, %c0_i32_0 : i32, i32
  }
  func.func @transform_2(%arg0: i32, %arg1: i32) -> (i32, i32) {
    %c0_i32 = arith.constant 0 : i32
    %c0_i32_0 = arith.constant 0 : i32
    %c0_i32_1 = arith.constant 0 : i32
    return %c0_i32, %c0_i32_0 : i32, i32
  }
  func.func @transform_3(%arg0: i32, %arg1: i32) -> (i32, i32, i32, i32) {
    %c0_i32 = arith.constant 0 : i32
    %c0_i32_0 = arith.constant 0 : i32
    %c0_i32_1 = arith.constant 0 : i32
    return %arg0, %arg1, %c0_i32, %c0_i32_0 : i32, i32, i32, i32
  }
}

</mosaic_0001>

<bundles_post_ra>
// kernel: tpu_custom_call.1
= control target key start
LH: loop header
LB: loop body
LE: loop exit
PB: predicated region body
PF: predicated region fallthrough
CT: control target
= control target key end

     0   :  { %8 = vsyncpa [#allocation3], 0  ;;  %s1085_s0 = inlined_call_operand.hbm [shape: bf16[2,1,8,512], index: 0, kind: input, shape index: {}]   ;;  %s1086_s1 = inlined_call_operand.vmem [shape: bf16[16,72], index: 1, kind: input, shape index: {}]   ;;  %s1087_s2 = inlined_call_operand.vmem [shape: f32[16,1], index: 2, kind: input, shape index: {}]   ;;  %s1088_s3 = inlined_call_operand.hbm [shape: f32[2,1,16,384], index: 3, kind: output, shape index: {}]  }
   0x1   :  { %10 = vsyncpa [#allocation3 + $0x1], 0 }
   0x2   :  { %11 = vsyncpa [#allocation4], 0 }
   0x3   :  { %13 = vsyncpa [#allocation4 + $0x1], 0  ;;  %s864_s12 = smov 0   ;;  %s866_s13 = smov 0  }
   0x4   :  { %s868_s14 = smov 0   ;;  %s870_s15 = smov 0  }
   0x5   :  { %s872_s16 = smov 0   ;;  %s874_s17 = smov 0  }
   0x6 LB: > { %s594_s18 = sadd.s32 4294967295, %s827_s17   ;;  %s595_s19 = sadd.s32 4294967294, %s827_s17   ;;  %s827_s17 = sphi %s874_s17, %s19_s17   ;;  %s823_s16 = sphi %s872_s16, %s1100_s16   ;;  %s819_s15 = sphi %s870_s15, %s1099_s15   ;;  %s815_s14 = sphi %s868_s14, %s1098_s14   ;;  %s811_s13 = sphi %s866_s13, %s1097_s13   ;;  %s807_s12 = sphi %s864_s12, %s1096_s12  }
   0x7   : > { %s31_s20 = sadd.s32 1, %s823_s16  ;;  %s40_s21 = sadd.s32 1, %s815_s14 }
   0x8   : > { %p33_p0 = scmp.ge.s32.totalorder %s31_s20, 2  ;;  %p47_p1 = scmp.ne.s32.totalorder %s815_s14, %s811_s13 }
   0x9   : > { %p48_p2 = scmp.eq.s32.totalorder %s827_s17, 0  ;;  %p53_p3 = scmp.ne.s32.totalorder %s811_s13, %s807_s12 }
   0xa   : > { %s1102_s20 = smov (%p33_p0, %s31_s20), 0  ;;  %p54_p5 = scmp.eq.s32.totalorder %s594_s18, 0 }
   0xb   : > { %p905_p4 = por %p48_p2, %p47_p1  ;;  %s35_s23 = ssub.s32 %s823_s16, %s1102_s20 }
   0xc   : > { %p121_p6 = scmp.eq.s32.totalorder %s594_s18, 1  ;;  %p38_p7 = scmp.eq.s32.totalorder %s35_s23, 0 }
   0xd   : > { %p911_p8 = por %p54_p5, %p53_p3  ;;  %p127_p10 = scmp.eq.s32.totalorder %s595_s19, 1 }
   0xe   : > { %p915_p9 = por %p121_p6, %p47_p1  ;;  %p649_p13 = scmp.lt.s32.totalorder %s827_s17, 2 }
   0xf   : > { %s920_s26 = scalar_select %p38_p7, %s815_s14, %s40_s21  }
  0x10   : > { %p922_p11 = por %p127_p10, %p53_p3  ;;  %s153_s28 = sand.u32 1, %s815_s14  }
  0x11   : > { %s598_s29 = sshll.u32 %s153_s28, 4  ;;  %s614_s30 = sshll.u32 %s823_s16, 8 }
  0x12   : > { %s1092_s27 = scalar_select %p922_p11, 1, 0 }
  0x13   : > { %s165_s6 = scalar_lea.hbm %s1085_s0, %s614_s30  ;;  %s157_s7 = scalar_lea.vmem [#allocation2], %s598_s29 }
  0x14   : > { %s167_s8 = sshll.u32 %s157_s7, 4  ;;  %p935_p0 = pnand %p649_p13, %p905_p4  ;;  %s168_s8 = int_to_ptr.vmem [resolvable:$true] %s167_s8 }
  0x15   : > { %p601_p1 = scmp.ge.s32.totalorder %s827_s17, 1  ;;  %p172_p2 = scmp.lt.s32.totalorder %s827_s17, 3 }
  0x16   : > { %s154_s10 = scalar_lea.sflag [#allocation3], %s153_s28  ;;  %p721_p3 = pneg %p935_p0 }
  0x17   : > { %s732_s11 = scalar_lea.vmem %s168_s8, 256  ;;  %s829_s18 = smov [#allocation2]  }
  0x18   : > { %p733_p5 = scmp.ne.s32.totalorder %s168_s8, %s732_s11  ;;  %s737_s19 = sshll.u32 %s829_s18, 4  ;;  %s738_s19 = int_to_ptr.vmem [resolvable:$false] %s737_s19 }
  0x19   : > { %s739_s21 = scalar_lea.vmem %s738_s19, 512  ;;  %p740_p10 = scmp.lt.s32.totalorder %s168_s8, %s738_s19 }
  0x1a   : > { %p735_p6 = pnand %p733_p5, %p721_p3  ;;  %p741_p12 = scmp.lt.s32.totalorder %s739_s21, %s732_s11 }
  0x1c   : > { %p736_p7 = pneg %p735_p6  ;;  %p742_p4 = por %p741_p12, %p740_p10 }
  0x1e   : > { %p743_p13 = pnand %p742_p4, %p736_p7 }
  0x20   : > { %746 = shalt.err (!%p743_p13)
}
  0x21   : > { %644 = dma.hbm_to_vmem [thread:$0]  (!%p935_p0), %s165_s6, 256, %s168_s8, %s154_s10  }
  0x22   : > { %p173_p11 = pnand %p601_p1, %p172_p2 }
  0x23   : > { %s950_s22 = sand.u32 (!%p173_p11), 1, %s811_s13  }
  0x24   : > { %176 = sbr.rel (%p173_p11) target bundleno = 442 (0x1ba), region = 32  ;;  %s602_s23 = sshll.u32 (!%p173_p11), %s950_s22, 4 }
  0x25   : > { %s179_s28 = scalar_lea.sflag (!%p173_p11), [#allocation3], %s950_s22  ;;  %s182_s29 = scalar_lea.vmem (!%p173_p11), [#allocation2], %s602_s23 }
  0x29   : > { %798 = dma.done.wait (%p911_p8), %s179_s28, 256  }
  0x2a   : > { %800 = vsyncadd (%p911_p8), %s179_s28, 4294967040  ;;  %v830_v0 = vmov 0.0   ;;  %v207_v1 = vld [vmem:[%s182_s29 + $0x8] sm:$0xff]  ;;  %v206_v2 = vld [vmem:[%s182_s29] sm:$0xff]  ;;  %s831_s30 = smov 90   ;;  %s832_s24 = smov 92  }
  0x2b   : > { %621 = vmatprep.subr.bf16.mxu1 %v830_v0  ;;  %v959_v3 = vcombine.low %v207_v1, %v207_v1  ;;  %v961_v4 = vcombine.low %v206_v2, %v206_v2  ;;  %v606_v5 = vcombine.high %v207_v1, %v207_v1  ;;  %v965_v6 = vcombine.high %v206_v2, %v206_v2  ;;  %s833_s4 = smov 91   ;;  %s834_s5 = smov 109   ;;  %v365_v8 = vld [vmem:[%s1087_s2] sm:$0xff]  ;;  %v366_v9 = vld [vmem:[%s1087_s2 + $0x8] sm:$0xff] }
  0x2c   : > { %s835_s6 = smov 108   ;;  %s836_s7 = smov 126   ;;  %v838_v7 = vmov 0   ;;  %vm839_vm0 = vmmov 0   ;;  %vm310_vm1 = vcmask 736256   ;;  %vm314_vm2 = vcmask 1043456  }
  0x2d   : > { %306 = vrot.lane.b32.xlu1 %v959_v3, %s831_s30  ;;  %302 = vrot.lane.b32.xlu0 %v961_v4, %s831_s30  ;;  %s837_s8 = smov 110   ;;  %s840_s9 = smov 127   ;;  %vm286_vm3 = vcmask 752640   ;;  %vm298_vm4 = vcmask 744448   ;;  %vm262_vm5 = vcmask 891904   ;;  %vm274_vm6 = vcmask 883712  }
  0x2e   : > { %427 = vmatprep.mubr.bf16.mxu0 %v838_v7  ;;  %631 = vmatprep.mubr.msk.bf16.mxu1 %vm839_vm0, %v830_v0  ;;  %vm238_vm7 = vcmask 1031168   ;;  %vm250_vm8 = vcmask 900096   ;;  %vm226_vm9 = vcmask 1039360   ;;  %vm382_vm10 = vcmask 588800   ;;  %s635_s28 = smul.u32 48, %s950_s22 }
  0x2f   : > { %712 = vset.pattern.permute.xlu0 %v838_v7  ;;  %713 = vset.pattern.permute.xlu1 %v838_v7 }
  0x30   : > { %s204_s29 = scalar_lea.vmem [#allocation5], %s635_s28 }
  0x31   : > { %308 = vrot.lane.b32.xlu1 %v606_v5, %s831_s30  ;;  %304 = vrot.lane.b32.xlu0 %v965_v6, %s831_s30  ;;  %s507_s30 = sshll.u32 %s204_s29, 4  ;;  %s1032_s30 = int_to_ptr.vmem [resolvable:$true] %s507_s30 }
  0x35   : > { %282 = vrot.lane.b32.xlu1 %v959_v3, %s832_s24  ;;  %280 = vrot.lane.b32.xlu0 %v965_v6, %s832_s24 }
  0x39   : > { %294 = vrot.lane.b32.xlu1 %v959_v3, %s833_s4  ;;  %292 = vrot.lane.b32.xlu0 %v965_v6, %s833_s4 }
  0x3d   : > { %290 = vrot.lane.b32.xlu1 %v961_v4, %s833_s4  ;;  %278 = vrot.lane.b32.xlu0 %v961_v4, %s832_s24 }
  0x41   : > { %296 = vrot.lane.b32.xlu1 %v606_v5, %s833_s4  ;;  %284 = vrot.lane.b32.xlu0 %v606_v5, %s832_s24  ;;  %s636_s24 = smul.u32 768, %s819_s15 }
  0x45   : > { %258 = vrot.lane.b32.xlu1 %v959_v3, %s834_s5  ;;  %256 = vrot.lane.b32.xlu0 %v965_v6, %s834_s5 }
  0x49   : > { %270 = vrot.lane.b32.xlu1 %v959_v3, %s835_s6  ;;  %268 = vrot.lane.b32.xlu0 %v965_v6, %s835_s6 }
  0x4d   : > { %266 = vrot.lane.b32.xlu1 %v961_v4, %s835_s6  ;;  %254 = vrot.lane.b32.xlu0 %v961_v4, %s834_s5 }
  0x51   : > { %272 = vrot.lane.b32.xlu1 %v606_v5, %s835_s6  ;;  %260 = vrot.lane.b32.xlu0 %v606_v5, %s834_s5  ;;  %s1037_s5 = scalar_lea.hbm %s1088_s3, %s636_s24  ;;  %s492_s6 = scalar_lea.sflag [#allocation4], %s950_s22 }
  0x55   : > { %234 = vrot.lane.b32.xlu1 %v959_v3, %s836_s7  ;;  %232 = vrot.lane.b32.xlu0 %v965_v6, %s836_s7 }
  0x59   : > { %246 = vrot.lane.b32.xlu1 %v959_v3, %s837_s8  ;;  %244 = vrot.lane.b32.xlu0 %v965_v6, %s837_s8 }
  0x5d   : > { %242 = vrot.lane.b32.xlu1 %v961_v4, %s837_s8  ;;  %230 = vrot.lane.b32.xlu0 %v961_v4, %s836_s7 }
  0x61   : > { %248 = vrot.lane.b32.xlu1 %v606_v5, %s837_s8  ;;  %236 = vrot.lane.b32.xlu0 %v606_v5, %s836_s7  ;;  %s747_s7 = scalar_lea.vmem %s1032_s30, 768  ;;  %s841_s8 = smov [#allocation5]  }
  0x62   : > { %p748_p8 = scmp.ne.s32.totalorder %s1032_s30, %s747_s7 }
  0x64   : > { %p749_p11 = pnand %p748_p8, %p915_p9 }
  0x65   : > { %222 = vrot.lane.b32.xlu1 %v959_v3, %s840_s9  ;;  %220 = vrot.lane.b32.xlu0 %v965_v6, %s840_s9 }
  0x66   : > { %p750_p12 = pneg %p749_p11 }
  0x69   : > { %224 = vrot.lane.b32.xlu1 %v606_v5, %s840_s9  ;;  %218 = vrot.lane.b32.xlu0 %v961_v4, %s840_s9  ;;  %s751_s9 = sshll.u32 %s841_s8, 4  ;;  %s752_s9 = int_to_ptr.vmem [resolvable:$false] %s751_s9 }
  0x6a   : > { %s753_s10 = scalar_lea.vmem %s752_s9, 1536  ;;  %p754_p0 = scmp.lt.s32.totalorder %s1032_s30, %s752_s9 }
  0x6b   : > { %p755_p1 = scmp.lt.s32.totalorder %s753_s10, %s747_s7 }
  0x6d   : > { %369 = vperm.xlu0 %712, %v365_v8   ;;  %374 = vperm.xlu1 %713, %v366_v9   ;;  %p756_p2 = por %p755_p1, %p754_p0 }
  0x6f   : > { %p757_p3 = pnand %p756_p2, %p750_p12 }
  0x9f   : > { %v307_v10 = vpop.permute.xlu1 %306  ;;  %v303_v11 = vpop.permute.xlu0 %302 }
  0xa3   : > { %v309_v12 = vpop.permute.xlu1 %308  ;;  %v305_v13 = vpop.permute.xlu0 %304 }
  0xa4   : > { %v312_v14 = vsel %vm310_vm1, %v305_v13, %v307_v10  ;;  %v311_v15 = vsel %vm310_vm1, %v303_v11, %v305_v13  ;;  %v313_v16 = vsel %vm310_vm1, %v307_v10, %v309_v12 }
  0xa5   : > { %608 = vmatprep.subr.msk.bf16.mxu0 %vm314_vm2, %v312_v14  ;;  %v387_v17 = vsel %vm314_vm2, %v311_v15, 0  ;;  %v393_v18 = vsel %vm314_vm2, %v313_v16, 0 }
  0xa6   : > { %402 = vmatpush1.bf16.msra.mxu0 %v387_v17  ;;  %622 = vmatpush3.bf16.msra.mxu1 %v393_v18 }
  0xa7   : > { %v283_v19 = vpop.permute.xlu1 %282  ;;  %v281_v20 = vpop.permute.xlu0 %280  ;;  %623 = vmatprep.subr.bf16.mxu1 %v830_v0 }
  0xa8   : > { %v288_v23 = vsel %vm286_vm3, %v281_v20, %v283_v19 }
  0xab   : > { %v295_v21 = vpop.permute.xlu1 %294  ;;  %v293_v22 = vpop.permute.xlu0 %292 }
  0xac   : > { %v300_v24 = vsel %vm298_vm4, %v293_v22, %v295_v21 }
  0xad   : > { %v357_v25 = vsel %vm314_vm2, %v288_v23, %v300_v24 }
  0xae   : > { %403 = vmatprep.subr.bf16.mxu0 %v357_v25 }
  0xaf   : > { %v291_v26 = vpop.permute.xlu1 %290  ;;  %v279_v27 = vpop.permute.xlu0 %278 }
  0xb0   : > { %v299_v28 = vsel %vm298_vm4, %v291_v26, %v293_v22  ;;  %v287_v29 = vsel %vm286_vm3, %v279_v27, %v281_v20 }
  0xb1   : > { %v353_v30 = vsel %vm314_vm2, %v287_v29, %v299_v28 }
  0xb2   : > { %404 = vmatpush1.bf16.msra.mxu0 %v353_v30 }
  0xb3   : > { %v297_v31 = vpop.permute.xlu1 %296  ;;  %v285_v32 = vpop.permute.xlu0 %284 }
  0xb4   : > { %v301_v33 = vsel %vm298_vm4, %v295_v21, %v297_v31  ;;  %v289_v34 = vsel %vm286_vm3, %v283_v19, %v285_v32 }
  0xb5   : > { %v361_v35 = vsel %vm314_vm2, %v289_v34, %v301_v33 }
  0xb6   : > { %624 = vmatpush3.bf16.msra.mxu1 %v361_v35 }
  0xb7   : > { %v259_v36 = vpop.permute.xlu1 %258  ;;  %v257_v37 = vpop.permute.xlu0 %256  ;;  %625 = vmatprep.subr.bf16.mxu1 %v830_v0 }
  0xb8   : > { %v264_v40 = vsel %vm262_vm5, %v257_v37, %v259_v36 }
  0xbb   : > { %v271_v38 = vpop.permute.xlu1 %270  ;;  %v269_v39 = vpop.permute.xlu0 %268 }
  0xbc   : > { %v276_v41 = vsel %vm274_vm6, %v269_v39, %v271_v38 }
  0xbd   : > { %v345_v42 = vsel %vm314_vm2, %v264_v40, %v276_v41 }
  0xbe   : > { %405 = vmatprep.subr.bf16.mxu0 %v345_v42 }
  0xbf   : > { %v267_v43 = vpop.permute.xlu1 %266  ;;  %v255_v44 = vpop.permute.xlu0 %254 }
  0xc0   : > { %v275_v45 = vsel %vm274_vm6, %v267_v43, %v269_v39  ;;  %v263_v46 = vsel %vm262_vm5, %v255_v44, %v257_v37 }
  0xc1   : > { %v341_v47 = vsel %vm314_vm2, %v263_v46, %v275_v45 }
  0xc2   : > { %406 = vmatpush1.bf16.msra.mxu0 %v341_v47 }
  0xc3   : > { %v273_v48 = vpop.permute.xlu1 %272  ;;  %v261_v49 = vpop.permute.xlu0 %260 }
  0xc4   : > { %v277_v50 = vsel %vm274_vm6, %v271_v38, %v273_v48  ;;  %v265_v51 = vsel %vm262_vm5, %v259_v36, %v261_v49 }
  0xc5   : > { %v349_v52 = vsel %vm314_vm2, %v265_v51, %v277_v50 }
  0xc6   : > { %626 = vmatpush3.bf16.msra.mxu1 %v349_v52 }
  0xc7   : > { %v235_v53 = vpop.permute.xlu1 %234  ;;  %v233_v54 = vpop.permute.xlu0 %232  ;;  %627 = vmatprep.subr.bf16.mxu1 %v830_v0 }
  0xc8   : > { %v240_v57 = vsel %vm238_vm7, %v233_v54, %v235_v53 }
  0xcb   : > { %v247_v55 = vpop.permute.xlu1 %246  ;;  %v245_v56 = vpop.permute.xlu0 %244 }
  0xcc   : > { %v252_v58 = vsel %vm250_vm8, %v245_v56, %v247_v55 }
  0xcd   : > { %v333_v59 = vsel %vm314_vm2, %v240_v57, %v252_v58 }
  0xce   : > { %407 = vmatprep.subr.bf16.mxu0 %v333_v59 }
  0xcf   : > { %v243_v60 = vpop.permute.xlu1 %242  ;;  %v231_v61 = vpop.permute.xlu0 %230 }
  0xd0   : > { %v251_v62 = vsel %vm250_vm8, %v243_v60, %v245_v56  ;;  %v239_v63 = vsel %vm238_vm7, %v231_v61, %v233_v54 }
  0xd1   : > { %v329_v1 = vsel %vm314_vm2, %v239_v63, %v251_v62 }
  0xd2   : > { %408 = vmatpush1.bf16.msra.mxu0 %v329_v1 }
  0xd3   : > { %v249_v2 = vpop.permute.xlu1 %248  ;;  %v237_v5 = vpop.permute.xlu0 %236 }
  0xd4   : > { %v253_v7 = vsel %vm250_vm8, %v247_v55, %v249_v2  ;;  %v241_v8 = vsel %vm238_vm7, %v235_v53, %v237_v5 }
  0xd5   : > { %v337_v9 = vsel %vm314_vm2, %v241_v8, %v253_v7 }
  0xd6   : > { %628 = vmatpush3.bf16.msra.mxu1 %v337_v9 }
  0xd7   : > { %v223_v10 = vpop.permute.xlu1 %222  ;;  %v221_v11 = vpop.permute.xlu0 %220  ;;  %629 = vmatprep.subr.bf16.mxu1 %v830_v0  ;;  %v718_v0 = vld [vmem:[%s1086_s1] sm:$0xff]  }
  0xd8   : > { %v228_v12 = vsel %vm226_vm9, %v221_v11, %v223_v10 }
  0xd9   : > { %v321_v13 = vsel %vm314_vm2, %v965_v6, %v228_v12 }
  0xda   : > { %409 = vmatprep.subr.bf16.mxu0 %v321_v13 }
  0xdb   : > { %v225_v14 = vpop.permute.xlu1 %224  ;;  %v219_v15 = vpop.permute.xlu0 %218 }
  0xdc   : > { %v229_v16 = vsel %vm226_vm9, %v223_v10, %v225_v14  ;;  %v227_v17 = vsel %vm226_vm9, %v219_v15, %v221_v11 }
  0xdd   : > { %v317_v18 = vsel %vm314_vm2, %v961_v4, %v227_v17  ;;  %v325_v19 = vsel %vm314_vm2, %v959_v3, %v229_v16 }
  0xde   : > { %410 = vmatpush1.bf16.msra.mxu0 %v317_v18  ;;  %630 = vmatpush3.bf16.msra.mxu1 %v325_v19 }
  0xe1   : > { %609 = vmatmul.mubr.msk.bf16.vlgmr.msra.gmra.mxu0 %vm382_vm10, %v718_v0  ;;  %632 = vmatmul.mubr.msk.bf16.vlgmr.msra.gmra.mxu1 %vm382_vm10, %v718_v0 }
  0xe8   : > { %v370_v6 = vpop.permute.xlu0 %369  ;;  %v375_v4 = vpop.permute.xlu1 %374 }
 0x1a1   : > { %v429_v20 = vpop.f32.mrf.mxu0  ;;  %v472_v21 = vpop.f32.mrf.mxu1 }
 0x1a2   : > { %v430_v22 = vadd.f32 %v429_v20, %v370_v6  ;;  %v473_v23 = vadd.f32 %v472_v21, %v370_v6 }
 0x1a3   : > { %v431_v24 = vpop.f32.mrf.mxu0  ;;  %v633_v25 = vpop.f32.mrf.mxu1 }
 0x1a4   : > { %v479_v3 = vmax.f32 %v430_v22, 0.0  ;;  %v481_v26 = vmax.f32 %v473_v23, 0.0  ;;  %v432_v27 = vadd.f32 %v431_v24, %v370_v6 }
 0x1a5   : > { %v433_v28 = vpop.f32.mrf.mxu0  ;;  %v475_v29 = vpop.f32.mrf.mxu1 }
 0x1a6   : > { %485 = vst [vmem:[%s204_s29] sm:$0xff] %v479_v3  ;;  %487 = vst [vmem:[%s204_s29 + $0x10] sm:$0xff] %v481_v26  ;;  %v480_v30 = vmax.f32 %v432_v27, 0.0  ;;  %v434_v31 = vadd.f32 %v433_v28, %v375_v4  ;;  %v476_v32 = vadd.f32 %v475_v29, %v375_v4 }
 0x1a7   : > { %v435_v33 = vpop.f32.mrf.mxu0  ;;  %v634_v34 = vpop.f32.mrf.mxu1 }
 0x1a8   : > { %486 = vst [vmem:[%s204_s29 + $0x8] sm:$0xff] %v480_v30  ;;  %v482_v35 = vmax.f32 %v434_v31, 0.0  ;;  %v484_v36 = vmax.f32 %v476_v32, 0.0  ;;  %v436_v37 = vadd.f32 %v435_v33, %v375_v4 }
 0x1aa   : > { %488 = vst [vmem:[%s204_s29 + $0x18] sm:$0xff] %v482_v35  ;;  %490 = vst [vmem:[%s204_s29 + $0x28] sm:$0xff] %v484_v36  ;;  %v483_v38 = vmax.f32 %v436_v37, 0.0 }
 0x1ac   : > { %489 = vst [vmem:[%s204_s29 + $0x20] sm:$0xff] %v483_v38 }
 0x1ad   : > { %760 = shalt.err (!%p757_p3)
}
 0x1ae   : > { %s761_s11 = scalar_lea.hbm %s1037_s5, 768  ;;  %s765_s21 = scalar_lea.hbm %s1088_s3, 1536 }
 0x1af   : > { %p762_p5 = scmp.ne.s32.totalorder %s1037_s5, %s761_s11  ;;  %p766_p10 = scmp.lt.s32.totalorder %s1037_s5, %s1088_s3 }
 0x1b0   : > { %p767_p4 = scmp.lt.s32.totalorder %s765_s21, %s761_s11 }
 0x1b1   : > { %p763_p6 = pnand %p762_p5, %p915_p9 }
 0x1b2   : > { %p768_p13 = por %p767_p4, %p766_p10 }
 0x1b3   : > { %p764_p7 = pneg %p763_p6 }
 0x1b5   : > { %p769_p8 = pnand %p768_p13, %p764_p7 }
 0x1b7   : > { %772 = shalt.err (!%p769_p8)
}
 0x1b8   : > { %s842_s29 = smov 384   ;;  %s843_s24 = smov 24  }
 0x1b9   : > { %639 = dma.vmem_to_hbm [thread:$0]  (%p915_p9), %s1032_s30, 768, %s1037_s5, %s492_s6, %s842_s29, %s842_s29, %s843_s24  }
 0x1ba PF: > { %s522_s4 = sand.u32 1, %s807_s12   ;;  %p1094_p11 = scmp.ne.s32.totalorder %s1092_s27, 0 }
 0x1bb   : > { %p1095_p12 = scmp.ge.s32.totalorder %s827_s17, 2  ;;  %s523_s15 = scalar_lea.sflag [#allocation4], %s522_s4 }
 0x1bd   : > { %p646_p0 = pnand %p1095_p12, %p1094_p11 }
 0x1bf   : > { %p647_p1 = pneg %p646_p0 }
 0x1c1   : > { %802 = dma.done.wait (%p647_p1), %s523_s15, 768  }
 0x1c2   : > { %804 = vsyncadd (%p647_p1), %s523_s15, 4294966528  ;;  %s19_s17 = sadd.s32 1, %s827_s17   ;;  %s1096_s12 = smov %s811_s13 }
 0x1c3   : > { %p16_p2 = scmp.ge.s32.totalorder %s19_s17, 4   ;;  %s1097_s13 = smov %s815_s14 }
 0x1c4   : > { %s1098_s14 = smov %s920_s26  ;;  %s1099_s15 = smov %s823_s16 }
 0x1c5   : > { %s1100_s16 = smov %s1102_s20  ;;  %18 = sbr.rel (!%p16_p2) target bundleno = 6 (0x6), region = 77 }
 0x1ca   :  { %528 = vsyncpa [#allocation3], 1 }
 0x1cb   :  { %530 = vsyncpa [#allocation3 + $0x1], 1 }
 0x1cc   :  { %531 = vsyncpa [#allocation4], 1 }
 0x1cd   :  { %533 = vsyncpa [#allocation4 + $0x1], 1 }

</bundles_post_ra>
